<compile_context>
chip_gen: v7x
topology: tpu7x:2x2x1
jax: 0.10.0
libtpu: 0.0.40
codegen_flags: <defaults>
</compile_context>

<pallas_src>
import jax
import jax.numpy as jnp
from jax.experimental import pallas as pl
from jax.experimental.pallas import tpu as pltpu

HIDDEN = 64          # hidden width of the PyTorch Reward_Model
HIDDEN_PAD = 128     # lane-padded hidden width used inside the kernel
OUT_DIM = 1
N_LAYERS = 5         # factor_reward_model_layers default
W5_ROWS = 8          # sublane-padded rows for the final-layer weight (row 0 real)


def _round_up(x, m):
    return (x + m - 1) // m * m


def _tpu_config():
    """Per-generation kernel configuration (core count, VMEM limit, dtypes)."""
    try:
        kind = jax.devices()[0].device_kind.lower()
    except Exception:  # pragma: no cover - no device visible at trace time
        kind = ""
    if "v7" in kind:
        # 2 TensorCores/chip, 64 MiB VMEM per TC, native bf16 VPU.
        return dict(parallel_cores=2, bf16_elementwise=True,
                    vmem_limit=48 << 20)
    if "v6" in kind:
        # 1 TC, 128 MiB VMEM, native bf16 VPU.
        return dict(parallel_cores=1, bf16_elementwise=True,
                    vmem_limit=64 << 20)
    if "v5e" in kind or "v5 lite" in kind or "v5lite" in kind:
        # 1 TC, 128 MiB VMEM, no bf16 VPU -> keep f32 elementwise.
        return dict(parallel_cores=1, bf16_elementwise=False,
                    vmem_limit=64 << 20)
    # Unknown / older chips: conservative defaults.
    return dict(parallel_cores=1, bf16_elementwise=False,
                vmem_limit=48 << 20)


def _derive_tile_rows(n8, d, x_itemsize, cfg, requested=None):
    """Pick the row-tile size: as big as the VMEM budget allows (default 4096)."""
    act_item = 2 if cfg["bf16_elementwise"] else 4
    # Per-row VMEM: double-buffered x tile, double-buffered output lane, and a
    # generous ~3 live (row, 128) activation buffers.
    per_row = 2 * d * x_itemsize + 2 * 4 + 3 * HIDDEN_PAD * act_item
    # Resident weights (double-buffered, bf16) -- small but account for them.
    weights_bytes = 2 * 2 * (d * HIDDEN_PAD + 3 * HIDDEN_PAD * HIDDEN_PAD
                             + (N_LAYERS - 1) * HIDDEN_PAD + W5_ROWS * HIDDEN_PAD)
    budget = cfg["vmem_limit"] // 2          # stay well under the scoped limit
    cap = max(256, (budget - weights_bytes) // per_row)

    tm = requested if requested is not None else 4096
    tm = min(tm, cap, n8)

    # Only on multi-TC chips (v7x): keep >= 2 grid steps per TensorCore when the
    # problem is large enough, so megacore sharding gives every core overlap work.
    min_steps = 2 * cfg["parallel_cores"]
    if cfg["parallel_cores"] > 1 and n8 >= 8 * min_steps and pl.cdiv(n8, tm) < min_steps:
        tm = pl.cdiv(n8, min_steps)

    tm = min(_round_up(max(tm, 8), 8), n8)
    return tm


def _make_mlp_kernel(elementwise_bf16):
    """Build the MLP kernel body for a given elementwise precision policy."""

    def kernel(x_ref, w1_ref, wh_ref, bh_ref, w5_ref, b5_ref, o_ref):
        def matmul(a, w):
            if elementwise_bf16:
                # bf16 x bf16 -> bf16 output (f32 MXU accumulation internally).
                return jnp.dot(a, w)
            return jnp.dot(a, w, preferred_element_type=jnp.float32)

        # Layer 1: (TM, d) @ (d, 128) on the MXU.
        x = x_ref[...].astype(jnp.bfloat16)
        h = matmul(x, w1_ref[...])
        h = jnp.maximum(h + bh_ref[0], 0.0)

        # Hidden layers 2..4: (TM, 128) @ (128, 128).
        for l in range(wh_ref.shape[0]):
            hin = h if elementwise_bf16 else h.astype(jnp.bfloat16)
            h = matmul(hin, wh_ref[l])
            h = jnp.maximum(h + bh_ref[l + 1], 0.0)

        # Final Linear(128 -> 1) as a transposed MXU matmul: w5 @ h^T lands the
        # per-row scalars lane-major (rows of this tile on lanes), avoiding the
        # XLU cross-lane reduce + sublane->lane relayout per tile. w5 rows 1..7
        # are zero padding; only row 0 is stored.
        hb = h if elementwise_bf16 else h.astype(jnp.bfloat16)
        out = jax.lax.dot_general(
            w5_ref[...], hb,
            dimension_numbers=(((1,), (1,)), ((), ())),
            preferred_element_type=jnp.float32)            # (8, TM) f32
        o_ref[...] = (out[0:1] + b5_ref[0]).reshape(o_ref.shape)

    return kernel


def _prepare_params(params, elementwise_bf16):
    """Pad / cast / stack the 5-layer MLP params once, wrapper-side.

    Returns (w1, wh, bh, w5, b5):
      w1: (d, 128) bf16
      wh: (3, 128, 128) bf16   (hidden layers 2..4, stacked)
      bh: (4, 1, 128) bf16|f32 (biases of layers 1..4, stacked; dtype follows
                                the elementwise policy)
      w5: (8, 128) bf16        (final layer weights on row 0, rows 1..7 zero)
      b5: (1,) f32             (scalar bias, lives in SMEM inside the kernel)
    Zero padding keeps the math exact (padded lanes/rows stay identically zero).
    """
    assert len(params) == N_LAYERS
    act_dtype = jnp.bfloat16 if elementwise_bf16 else jnp.float32

    w1 = jnp.asarray(params[0][0], jnp.float32)                    # (d, 64)
    w1 = jnp.pad(w1, ((0, 0), (0, HIDDEN_PAD - w1.shape[1])))
    w1 = w1.astype(jnp.bfloat16)

    hidden_ws, biases = [], []
    biases.append(jnp.pad(jnp.asarray(params[0][1], jnp.float32).reshape(-1),
                          (0, HIDDEN_PAD - HIDDEN)))
    for i in range(1, N_LAYERS - 1):
        w, b = params[i]
        w = jnp.asarray(w, jnp.float32)
        w = jnp.pad(w, ((0, HIDDEN_PAD - w.shape[0]),
                        (0, HIDDEN_PAD - w.shape[1])))
        hidden_ws.append(w.astype(jnp.bfloat16))
        biases.append(jnp.pad(jnp.asarray(b, jnp.float32).reshape(-1),
                              (0, HIDDEN_PAD - HIDDEN)))
    wh = jnp.stack(hidden_ws)                                      # (3,128,128)
    bh = jnp.stack(biases).reshape(N_LAYERS - 1, 1, HIDDEN_PAD).astype(act_dtype)

    w5_raw, b5_raw = params[-1]
    w5_col = jnp.asarray(w5_raw, jnp.float32).reshape(HIDDEN, OUT_DIM)[:, 0]
    w5 = jnp.zeros((W5_ROWS, HIDDEN_PAD), jnp.float32).at[0, :HIDDEN].set(w5_col)
    w5 = w5.astype(jnp.bfloat16)
    b5 = jnp.asarray(b5_raw, jnp.float32).reshape(1)
    return w1, wh, bh, w5, b5


def reward_mlp_pallas(x_flat, prepped, cfg, *, tile_rows=None):
    """x_flat: (N, d) float32/bfloat16 -> (N, 1) float32 rewards."""
    n, d = x_flat.shape
    w1, wh, bh, w5, b5 = prepped

    # Rows must be a multiple of 8 (sublane granularity); pad only if needed.
    n8 = _round_up(n, 8)
    x = x_flat if n8 == n else jnp.pad(x_flat, ((0, n8 - n), (0, 0)))

    tm = _derive_tile_rows(n8, d, x.dtype.itemsize, cfg, tile_rows)
    num_tiles = pl.cdiv(n8, tm)

    def resident(arr):
        nd = arr.ndim
        return pl.BlockSpec(arr.shape, lambda i, _nd=nd: (0,) * _nd)

    grid_spec = pl.GridSpec(
        grid=(num_tiles,),
        in_specs=[
            pl.BlockSpec((tm, d), lambda i: (i, 0)),               # x row tile
            resident(w1), resident(wh), resident(bh), resident(w5),
            pl.BlockSpec(memory_space=pltpu.MemorySpace.SMEM),     # b5 scalar
        ],
        # Lane-dense output: rows of each tile live on lanes of a (1, 1, TM) block.
        out_specs=pl.BlockSpec((1, 1, tm), lambda i: (i, 0, 0)),
    )

    flops = 2 * n8 * (d * HIDDEN_PAD
                      + (N_LAYERS - 2) * HIDDEN_PAD * HIDDEN_PAD
                      + HIDDEN_PAD)
    bytes_accessed = (x.dtype.itemsize * n8 * d + 4 * num_tiles * tm
                      + 2 * (d * HIDDEN_PAD + 3 * HIDDEN_PAD * HIDDEN_PAD
                             + W5_ROWS * HIDDEN_PAD)
                      + bh.dtype.itemsize * bh.size + 4)

    out = pl.pallas_call(
        _make_mlp_kernel(cfg["bf16_elementwise"]),
        out_shape=jax.ShapeDtypeStruct((num_tiles, 1, tm), jnp.float32),
        grid_spec=grid_spec,
        compiler_params=pltpu.CompilerParams(
            dimension_semantics=("parallel",),
            vmem_limit_bytes=int(cfg["vmem_limit"])),
        cost_estimate=pl.CostEstimate(
            flops=flops, transcendentals=0, bytes_accessed=bytes_accessed),
    )(x, w1, wh, bh, w5, b5)

    # (num_tiles, 1, TM) lane-dense slab -> (N, 1) rewards (drop padded rows).
    return out.reshape(num_tiles * tm)[:n].reshape(n, 1)


def init_reward_model_params(key, obs_dim, hidden_dim=HIDDEN, out_dim=OUT_DIM,
                             n_layers=N_LAYERS):
    """Kaiming-normal-style weights (as Reward_Model.init_weights), zero biases."""
    dims = [obs_dim] + [hidden_dim] * (n_layers - 1) + [out_dim]
    params = []
    for i in range(n_layers):
        key, sub = jax.random.split(key)
        w = jax.random.normal(sub, (dims[i], dims[i + 1]), jnp.float32) * jnp.sqrt(
            2.0 / dims[i])
        b = jnp.zeros((dims[i + 1],), jnp.float32)
        params.append((w, b))
    return params


def rrd_reward_decomposer_forward(states, params, *, tile_rows=None):
    """Mirror of RRDRewardDecomposer.forward with only_inference=True.

    states: (b, n_agents, t, obs_dim) -> rewards: (b, n_agents, t, 1) float32
    bf16 states are accepted directly (no extra HBM pass to cast them to f32).
    """
    b, na, t, d = states.shape
    if states.dtype not in (jnp.bfloat16, jnp.float32):
        states = states.astype(jnp.float32)          # mirrors torch .float()
    x = states.reshape(b * na * t, d)
    cfg = _tpu_config()
    prepped = _prepare_params(params, cfg["bf16_elementwise"])
    rewards = reward_mlp_pallas(x, prepped, cfg, tile_rows=tile_rows)
    return rewards.reshape(b, na, t, -1)


def _reference_forward_kernel_numerics(states, params, elementwise_bf16):
    """Mirrors the kernel numerics (bf16 matmul operands; f32 or bf16 elementwise)."""
    act = jnp.bfloat16 if elementwise_bf16 else jnp.float32
    b_, na, t, d = states.shape
    h = states.astype(jnp.float32).reshape(b_ * na * t, d)
    n_layers = len(params)
    for i, (w, bias) in enumerate(params):
        wbf = jnp.asarray(w, jnp.float32).astype(jnp.bfloat16)
        bias = jnp.asarray(bias, jnp.float32)
        if i < n_layers - 1:
            h = jnp.dot(h.astype(jnp.bfloat16), wbf, preferred_element_type=act)
            h = jnp.maximum(h + bias.astype(act), 0)
        else:
            h = jnp.dot(h.astype(jnp.bfloat16), wbf,
                        preferred_element_type=jnp.float32) + bias
    return h.astype(jnp.float32).reshape(b_, na, t, -1)


def _reference_forward_f32(states, params):
    b_, na, t, d = states.shape
    h = states.astype(jnp.float32).reshape(b_ * na * t, d)
    for i, (w, bias) in enumerate(params):
        h = jnp.dot(h, w, precision=jax.lax.Precision.HIGHEST) + bias
        if i < len(params) - 1:
            h = jnp.maximum(h, 0.0)
    return h.reshape(b_, na, t, -1)


if __name__ == "__main__":
    key = jax.random.PRNGKey(0)
    k_states, k_params = jax.random.split(key)

    # Small shapes consistent with the module: (batch, n_agents, timesteps, obs_dim)
    b, na, t, obs_dim = 2, 3, 8, 16
    states = jax.random.normal(k_states, (b, na, t, obs_dim), jnp.float32)
    params = init_reward_model_params(k_params, obs_dim)

    rewards = rrd_reward_decomposer_forward(states, params)
    rewards = jax.block_until_ready(rewards)
    assert rewards.shape == (b, na, t, 1)

    # Check against a reference with the same numerics as the generated kernel.
    cfg = _tpu_config()
    ref_match = _reference_forward_kernel_numerics(states, params,
                                                   cfg["bf16_elementwise"])
    assert jnp.allclose(rewards, ref_match, atol=1e-2, rtol=1e-2), float(
        jnp.max(jnp.abs(rewards - ref_match)))

    # Loose sanity check against the exact f32 reference (bf16 rounding drift).
    ref_f32 = _reference_forward_f32(states, params)
    assert jnp.allclose(rewards, ref_f32, atol=1.5e-1, rtol=1e-1), float(
        jnp.max(jnp.abs(rewards - ref_f32)))

    print("KERNEL_OK")
</pallas_src>

<mosaic_0001>
module attributes {stable_mosaic.version = 11 : i64} {
  func.func @kernel(%arg0: i32, %arg1: memref<48x16xf32, #tpu.memory_space<vmem>>, %arg2: memref<16x128xbf16, #tpu.memory_space<vmem>>, %arg3: memref<3x128x128xbf16, #tpu.memory_space<vmem>>, %arg4: memref<4x1x128xf32, #tpu.memory_space<vmem>>, %arg5: memref<8x128xbf16, #tpu.memory_space<vmem>>, %arg6: memref<1xf32, #tpu.memory_space<smem>>, %arg7: memref<1x1x48xf32, #tpu.memory_space<vmem>>) attributes {dimension_semantics = [#tpu.dimension_semantics<parallel>], iteration_bounds = array<i64: 1>, scalar_prefetch = 0 : i64, scratch_operands = 0 : i64, tpu.core_type = #tpu.core_type<tc>, window_params = [{transform_indices = @transform_0, window_bounds = array<i64: 48, 16>}, {pipeline_mode = #tpu.pipeline_mode<synchronous>, transform_indices = @transform_1, window_bounds = array<i64: 16, 128>}, {pipeline_mode = #tpu.pipeline_mode<synchronous>, transform_indices = @transform_2, window_bounds = array<i64: 3, 128, 128>}, {pipeline_mode = #tpu.pipeline_mode<synchronous>, transform_indices = @transform_3, window_bounds = array<i64: 4, 1, 128>}, {pipeline_mode = #tpu.pipeline_mode<synchronous>, transform_indices = @transform_4, window_bounds = array<i64: 8, 128>}, {transform_indices = @transform_5, window_bounds = array<i64: 1>}, {transform_indices = @transform_6, window_bounds = array<i64: 1, 1, 48>}]} {
    %c0 = arith.constant 0 : index
    %c0_0 = arith.constant 0 : index
    %0 = vector.load %arg1[%c0, %c0_0] : memref<48x16xf32, #tpu.memory_space<vmem>>, vector<48x16xf32>
    %1 = arith.truncf %0 : vector<48x16xf32> to vector<48x16xbf16>
    %c0_1 = arith.constant 0 : index
    %c0_2 = arith.constant 0 : index
    %2 = vector.load %arg2[%c0_1, %c0_2] : memref<16x128xbf16, #tpu.memory_space<vmem>>, vector<16x128xbf16>
    %cst = arith.constant dense<0.000000e+00> : vector<48x128xf32>
    %3 = tpu.matmul %1, %2, %cst {dimension_numbers = #tpu.dot_dimension_numbers<[1], [0], [0], [1], [0, 0, 1, 1], [], []>} : vector<48x16xbf16>, vector<16x128xbf16>, vector<48x128xf32> -> vector<48x128xf32>
    %c0_3 = arith.constant 0 : index
    %c0_4 = arith.constant 0 : index
    %c0_5 = arith.constant 0 : index
    %4 = vector.load %arg4[%c0_3, %c0_4, %c0_5] : memref<4x1x128xf32, #tpu.memory_space<vmem>>, vector<1x1x128xf32>
    %5 = vector.shape_cast %4 : vector<1x1x128xf32> to vector<1x128xf32>
    %6 = vector.broadcast %5 : vector<1x128xf32> to vector<48x128xf32>
    %7 = arith.addf %3, %6 : vector<48x128xf32>
    %cst_6 = arith.constant 0.000000e+00 : f32
    %8 = vector.broadcast %cst_6 : f32 to vector<48x128xf32>
    %9 = arith.maximumf %7, %8 : vector<48x128xf32>
    %10 = arith.truncf %9 : vector<48x128xf32> to vector<48x128xbf16>
    %c0_7 = arith.constant 0 : index
    %c0_8 = arith.constant 0 : index
    %c0_9 = arith.constant 0 : index
    %11 = vector.load %arg3[%c0_7, %c0_8, %c0_9] : memref<3x128x128xbf16, #tpu.memory_space<vmem>>, vector<1x128x128xbf16>
    %12 = vector.shape_cast %11 : vector<1x128x128xbf16> to vector<128x128xbf16>
    %cst_10 = arith.constant dense<0.000000e+00> : vector<48x128xf32>
    %13 = tpu.matmul %10, %12, %cst_10 {dimension_numbers = #tpu.dot_dimension_numbers<[1], [0], [0], [1], [0, 0, 1, 1], [], []>} : vector<48x128xbf16>, vector<128x128xbf16>, vector<48x128xf32> -> vector<48x128xf32>
    %c1 = arith.constant 1 : index
    %c0_11 = arith.constant 0 : index
    %c0_12 = arith.constant 0 : index
    %14 = vector.load %arg4[%c1, %c0_11, %c0_12] : memref<4x1x128xf32, #tpu.memory_space<vmem>>, vector<1x1x128xf32>
    %15 = vector.shape_cast %14 : vector<1x1x128xf32> to vector<1x128xf32>
    %16 = vector.broadcast %15 : vector<1x128xf32> to vector<48x128xf32>
    %17 = arith.addf %13, %16 : vector<48x128xf32>
    %cst_13 = arith.constant 0.000000e+00 : f32
    %18 = vector.broadcast %cst_13 : f32 to vector<48x128xf32>
    %19 = arith.maximumf %17, %18 : vector<48x128xf32>
    %20 = arith.truncf %19 : vector<48x128xf32> to vector<48x128xbf16>
    %c1_14 = arith.constant 1 : index
    %c0_15 = arith.constant 0 : index
    %c0_16 = arith.constant 0 : index
    %21 = vector.load %arg3[%c1_14, %c0_15, %c0_16] : memref<3x128x128xbf16, #tpu.memory_space<vmem>>, vector<1x128x128xbf16>
    %22 = vector.shape_cast %21 : vector<1x128x128xbf16> to vector<128x128xbf16>
    %cst_17 = arith.constant dense<0.000000e+00> : vector<48x128xf32>
    %23 = tpu.matmul %20, %22, %cst_17 {dimension_numbers = #tpu.dot_dimension_numbers<[1], [0], [0], [1], [0, 0, 1, 1], [], []>} : vector<48x128xbf16>, vector<128x128xbf16>, vector<48x128xf32> -> vector<48x128xf32>
    %c2 = arith.constant 2 : index
    %c0_18 = arith.constant 0 : index
    %c0_19 = arith.constant 0 : index
    %24 = vector.load %arg4[%c2, %c0_18, %c0_19] : memref<4x1x128xf32, #tpu.memory_space<vmem>>, vector<1x1x128xf32>
    %25 = vector.shape_cast %24 : vector<1x1x128xf32> to vector<1x128xf32>
    %26 = vector.broadcast %25 : vector<1x128xf32> to vector<48x128xf32>
    %27 = arith.addf %23, %26 : vector<48x128xf32>
    %cst_20 = arith.constant 0.000000e+00 : f32
    %28 = vector.broadcast %cst_20 : f32 to vector<48x128xf32>
    %29 = arith.maximumf %27, %28 : vector<48x128xf32>
    %30 = arith.truncf %29 : vector<48x128xf32> to vector<48x128xbf16>
    %c2_21 = arith.constant 2 : index
    %c0_22 = arith.constant 0 : index
    %c0_23 = arith.constant 0 : index
    %31 = vector.load %arg3[%c2_21, %c0_22, %c0_23] : memref<3x128x128xbf16, #tpu.memory_space<vmem>>, vector<1x128x128xbf16>
    %32 = vector.shape_cast %31 : vector<1x128x128xbf16> to vector<128x128xbf16>
    %cst_24 = arith.constant dense<0.000000e+00> : vector<48x128xf32>
    %33 = tpu.matmul %30, %32, %cst_24 {dimension_numbers = #tpu.dot_dimension_numbers<[1], [0], [0], [1], [0, 0, 1, 1], [], []>} : vector<48x128xbf16>, vector<128x128xbf16>, vector<48x128xf32> -> vector<48x128xf32>
    %c3 = arith.constant 3 : index
    %c0_25 = arith.constant 0 : index
    %c0_26 = arith.constant 0 : index
    %34 = vector.load %arg4[%c3, %c0_25, %c0_26] : memref<4x1x128xf32, #tpu.memory_space<vmem>>, vector<1x1x128xf32>
    %35 = vector.shape_cast %34 : vector<1x1x128xf32> to vector<1x128xf32>
    %36 = vector.broadcast %35 : vector<1x128xf32> to vector<48x128xf32>
    %37 = arith.addf %33, %36 : vector<48x128xf32>
    %cst_27 = arith.constant 0.000000e+00 : f32
    %38 = vector.broadcast %cst_27 : f32 to vector<48x128xf32>
    %39 = arith.maximumf %37, %38 : vector<48x128xf32>
    %40 = arith.truncf %39 : vector<48x128xf32> to vector<48x128xbf16>
    %c0_28 = arith.constant 0 : index
    %c0_29 = arith.constant 0 : index
    %41 = vector.load %arg5[%c0_28, %c0_29] : memref<8x128xbf16, #tpu.memory_space<vmem>>, vector<8x128xbf16>
    %cst_30 = arith.constant dense<0.000000e+00> : vector<8x48xf32>
    %42 = tpu.matmul %41, %40, %cst_30 {dimension_numbers = #tpu.dot_dimension_numbers<[1], [1], [0], [0], [0, 0, 1, 0], [], []>} : vector<8x128xbf16>, vector<48x128xbf16>, vector<8x48xf32> -> vector<8x48xf32>
    %43 = vector.extract_strided_slice %42 {offsets = [0, 0], sizes = [1, 48], strides = [1, 1]} : vector<8x48xf32> to vector<1x48xf32>
    %c0_31 = arith.constant 0 : index
    %44 = memref.load %arg6[%c0_31] : memref<1xf32, #tpu.memory_space<smem>>
    %45 = vector.broadcast %44 : f32 to vector<1x48xf32>
    %46 = arith.addf %43, %45 : vector<1x48xf32>
    %47 = vector.shape_cast %46 : vector<1x48xf32> to vector<1x1x48xf32>
    %c0_32 = arith.constant 0 : index
    %c0_33 = arith.constant 0 : index
    %c0_34 = arith.constant 0 : index
    %48 = vector.load %arg7[%c0_32, %c0_33, %c0_34] : memref<1x1x48xf32, #tpu.memory_space<vmem>>, vector<1x1x48xf32>
    tpu.vector_store %arg7[%c0_32, %c0_33, %c0_34], %47 {strides = array<i32>} : memref<1x1x48xf32, #tpu.memory_space<vmem>>, vector<1x1x48xf32>,
    return
  }
  func.func @transform_0(%arg0: i32) -> (i32, i32) {
    %c0_i32 = arith.constant 0 : i32
    %c0_i32_0 = arith.constant 0 : i32
    return %arg0, %c0_i32 : i32, i32
  }
  func.func @transform_1(%arg0: i32) -> (i32, i32) {
    %c0_i32 = arith.constant 0 : i32
    %c0_i32_0 = arith.constant 0 : i32
    %c0_i32_1 = arith.constant 0 : i32
    return %c0_i32, %c0_i32_0 : i32, i32
  }
  func.func @transform_2(%arg0: i32) -> (i32, i32, i32) {
    %c0_i32 = arith.constant 0 : i32
    %c0_i32_0 = arith.constant 0 : i32
    %c0_i32_1 = arith.constant 0 : i32
    %c0_i32_2 = arith.constant 0 : i32
    return %c0_i32, %c0_i32_0, %c0_i32_1 : i32, i32, i32
  }
  func.func @transform_3(%arg0: i32) -> (i32, i32, i32) {
    %c0_i32 = arith.constant 0 : i32
    %c0_i32_0 = arith.constant 0 : i32
    %c0_i32_1 = arith.constant 0 : i32
    %c0_i32_2 = arith.constant 0 : i32
    return %c0_i32, %c0_i32_0, %c0_i32_1 : i32, i32, i32
  }
  func.func @transform_4(%arg0: i32) -> (i32, i32) {
    %c0_i32 = arith.constant 0 : i32
    %c0_i32_0 = arith.constant 0 : i32
    %c0_i32_1 = arith.constant 0 : i32
    return %c0_i32, %c0_i32_0 : i32, i32
  }
  func.func @transform_5(%arg0: i32) -> i32 {
    %c0_i32 = arith.constant 0 : i32
    %c0_i32_0 = arith.constant 0 : i32
    return %c0_i32 : i32
  }
  func.func @transform_6(%arg0: i32) -> (i32, i32, i32) {
    %c0_i32 = arith.constant 0 : i32
    %c0_i32_0 = arith.constant 0 : i32
    %c0_i32_1 = arith.constant 0 : i32
    return %arg0, %c0_i32, %c0_i32_0 : i32, i32, i32
  }
}

</mosaic_0001>

<bundles_post_ra>
// kernel: tpu_custom_call.1
= control target key start
LH: loop header
LB: loop body
LE: loop exit
PB: predicated region body
PF: predicated region fallthrough
CT: control target
= control target key end

     0   :  { %12 = vsyncpa [#allocation4], 0  ;;  %s1041_s0 = inlined_call_operand.vmem [shape: f32[48,16], index: 0, kind: input, shape index: {}]   ;;  %s1042_s1 = inlined_call_operand.vmem [shape: bf16[16,128], index: 1, kind: input, shape index: {}]   ;;  %s1043_s2 = inlined_call_operand.hbm [shape: bf16[3,128,128], index: 2, kind: input, shape index: {}]   ;;  %s1044_s3 = inlined_call_operand.vmem [shape: f32[4,1,128], index: 3, kind: input, shape index: {}]   ;;  %s1045_s4 = inlined_call_operand.vmem [shape: bf16[8,128], index: 4, kind: input, shape index: {}]   ;;  %s1046_s5 = inlined_call_operand.<no memory space> [shape: f32[1], index: 5, kind: input, shape index: {}]   ;;  %s1047_s6 = inlined_call_operand.hbm [shape: f32[1,1,48], index: 6, kind: output, shape index: {}]  }
   0x1   :  { %13 = vsyncpa [#allocation5], 0  ;;  %s880_s21 = smov [#allocation3]   ;;  %s832_s25 = scalar_lea.hbm %s1043_s2, 3072 }
   0x2   :  { %s23_s22 = sshll.u32 %s880_s21, 4  ;;  %p833_p0 = scmp.ne.s32.totalorder %s1043_s2, %s832_s25  ;;  %s24_s22 = int_to_ptr.vmem [resolvable:$true] %s23_s22 }
   0x3   :  { %p836_p1 = scmp.lt.u32.totalorder %s832_s25, %s1043_s2 }
   0x5   :  { %p838_p2 = pnand %p836_p1, %p833_p0 }
   0x7   :  { %841 = shalt.err (!%p838_p2)
}
   0x8   :  { %s842_s30 = scalar_lea.vmem %s24_s22, 3072  ;;  %p847_p4 = scmp.lt.s32.totalorder %s24_s22, %s24_s22 }
   0x9   :  { %p843_p3 = scmp.ne.s32.totalorder %s24_s22, %s842_s30  ;;  %p848_p5 = scmp.lt.s32.totalorder %s842_s30, %s842_s30 }
   0xb   :  { %p849_p6 = por %p848_p5, %p847_p4 }
   0xd   :  { %p850_p7 = pnand %p849_p6, %p843_p3 }
   0xf   :  { %853 = shalt.err (!%p850_p7)
}
  0x10   :  { %s881_s7 = smov 64   ;;  %s882_s8 = smov 4  }
  0x11   :  { %29 = dma.hbm_to_vmem [thread:$0]  %s1043_s2, 3072, %s24_s22, [#allocation4], %s881_s7, %s881_s7, %s882_s8  }
  0x12   :  { %876 = dma.done.wait [#allocation4], 3072  }
  0x13   :  { %877 = vsyncadd [#allocation4], 4294964224  ;;  %v883_v0 = vmov 0.0   ;;  %vm884_vm0 = vmmov 0   ;;  %v807_v1 = vld [vmem:[%s1042_s1] sm:$0xff]   ;;  %v41_v3 = vld [vmem:[%s1041_s0 + $0x8] sm:$0xff] }
  0x14   :  { %693 = vmatprep.subr.bf16.mxu0 %v883_v0  ;;  %695 = vmatprep.mubr.msk.bf16.mxu0 %vm884_vm0, %v883_v0  ;;  %v40_v2 = vld [vmem:[%s1041_s0] sm:$0xff]  ;;  %vm64_vm1 = vcmask 130048   ;;  %v42_v6 = vld [vmem:[%s1041_s0 + $0x10] sm:$0xff]  ;;  %v809_v7 = vld [vmem:[#allocation3 + $0x8] sm:$0xff]   ;;  %s885_s9 = smov [#allocation6]   ;;  %vm600_vm2 = vcmask 385024  }
  0x15   :  { %707 = vmatprep.subr.bf16.mxu1 %v883_v0  ;;  %723 = vmatprep.mubr.msk.bf16.mxu1 %vm884_vm0, %v883_v0  ;;  %v46_v4 = vpack.c.bf16 %v41_v3, %v40_v2  ;;  %v808_v5 = vld [vmem:[#allocation3] sm:$0xff]   ;;  %v43_v8 = vld [vmem:[%s1041_s0 + $0x18] sm:$0xff]  ;;  %v810_v10 = vld [vmem:[#allocation3 + $0x10] sm:$0xff]   ;;  %s608_s10 = sshll.u32 %s885_s9, 4  ;;  %s609_s10 = int_to_ptr.vmem [resolvable:$true] %s608_s10 }
  0x16   :  { %694 = vmatpush3.bf16.msra.mxu0 %v807_v1  ;;  %708 = vmatpush3.bf16.msra.mxu1 %v808_v5  ;;  %v47_v9 = vpack.c.bf16 %v43_v8, %v42_v6  ;;  %v811_v11 = vld [vmem:[#allocation3 + $0x18] sm:$0xff]   ;;  %v44_v12 = vld [vmem:[%s1041_s0 + $0x20] sm:$0xff]  ;;  %v45_v13 = vld [vmem:[%s1041_s0 + $0x28] sm:$0xff]  ;;  %s854_s11 = scalar_lea.vmem %s609_s10, 16  ;;  %s858_s12 = scalar_lea.vmem %s609_s10, 32 }
  0x17   :  { %735 = vmatprep.subr.bf16.mxu0 %v883_v0  ;;  %709 = vmatprep.subr.bf16.mxu1 %v883_v0  ;;  %v812_v14 = vld [vmem:[#allocation3 + $0x20] sm:$0xff]   ;;  %v48_v15 = vpack.c.bf16 %v45_v13, %v44_v12  ;;  %v813_v16 = vld [vmem:[#allocation3 + $0x28] sm:$0xff]   ;;  %v814_v17 = vld [vmem:[#allocation3 + $0x30] sm:$0xff]   ;;  %p855_p8 = scmp.ne.s32.totalorder %s609_s10, %s854_s11  ;;  %p859_p9 = scmp.lt.s32.totalorder %s609_s10, %s609_s10 }
  0x18   :  { %v815_v18 = vld [vmem:[#allocation3 + $0x38] sm:$0xff]   ;;  %v816_v19 = vld [vmem:[#allocation3 + $0x40] sm:$0xff]   ;;  %v817_v20 = vld [vmem:[#allocation3 + $0x48] sm:$0xff]   ;;  %p860_p10 = scmp.lt.s32.totalorder %s858_s12, %s854_s11 }
  0x19   :  { %696 = vmatmul.mubr.msk.bf16.vlgmr.msra.gmra.mrb[0].mxu0 %vm64_vm1, %v46_v4  ;;  %v818_v21 = vld [vmem:[#allocation3 + $0x50] sm:$0xff]   ;;  %v819_v22 = vld [vmem:[#allocation3 + $0x58] sm:$0xff]   ;;  %v820_v23 = vld [vmem:[#allocation3 + $0x60] sm:$0xff]  }
  0x1a   :  { %699 = vmatprep.mubr.msk.bf16.mxu0 %vm884_vm0, %v883_v0  ;;  %710 = vmatpush3.bf16.msra.mxu1 %v809_v7  ;;  %v821_v24 = vld [vmem:[#allocation3 + $0x68] sm:$0xff]   ;;  %v617_v25 = vld [vmem:[%s1044_s3] ss:$0 sm:$0xff]  ;;  %v822_v53 = vld [vmem:[#allocation3 + $0x70] sm:$0xff]   ;;  %p861_p11 = por %p860_p10, %p859_p9 }
  0x1b   :  { %711 = vmatprep.subr.bf16.mxu1 %v883_v0  ;;  %736 = vmatpush3.bf16.msra.mxu0 %v816_v19  ;;  %v823_v54 = vld [vmem:[#allocation3 + $0x78] sm:$0xff]   ;;  %v824_v55 = vld [vmem:[#allocation3 + $0x80] sm:$0xff]   ;;  %v825_v56 = vld [vmem:[#allocation3 + $0x88] sm:$0xff]  }
  0x1c   :  { %737 = vmatprep.subr.bf16.mxu0 %v883_v0  ;;  %v826_v57 = vld [vmem:[#allocation3 + $0x90] sm:$0xff]   ;;  %v827_v58 = vld [vmem:[#allocation3 + $0x98] sm:$0xff]   ;;  %v828_v59 = vld [vmem:[#allocation3 + $0xa0] sm:$0xff]   ;;  %p862_p12 = pnand %p861_p11, %p855_p8 }
  0x1d   :  { %v829_v60 = vld [vmem:[#allocation3 + $0xa8] sm:$0xff]   ;;  %v623_v61 = vld [vmem:[%s1044_s3 + $0x1] ss:$0 sm:$0xff] }
  0x1e   :  { %712 = vmatpush3.bf16.msra.mxu1 %v810_v10 }
  0x1f   :  { %713 = vmatprep.subr.bf16.mxu1 %v883_v0  ;;  %738 = vmatpush3.bf16.msra.mxu0 %v817_v20 }
  0x20   :  { %739 = vmatprep.subr.bf16.mxu0 %v883_v0 }
  0x21   :  { %700 = vmatmul.mubr.msk.bf16.gmra.mrb[4].mxu0 %vm64_vm1, %v47_v9 }
  0x22   :  { %703 = vmatprep.mubr.msk.bf16.mxu0 %vm884_vm0, %v883_v0  ;;  %714 = vmatpush3.bf16.msra.mxu1 %v811_v11 }
  0x23   :  { %715 = vmatprep.subr.bf16.mxu1 %v883_v0  ;;  %740 = vmatpush3.bf16.msra.mxu0 %v818_v21 }
  0x24   :  { %741 = vmatprep.subr.bf16.mxu0 %v883_v0 }
  0x26   :  { %716 = vmatpush3.bf16.msra.mxu1 %v812_v14 }
  0x27   :  { %717 = vmatprep.subr.bf16.mxu1 %v883_v0  ;;  %742 = vmatpush3.bf16.msra.mxu0 %v819_v22 }
  0x28   :  { %743 = vmatprep.subr.bf16.mxu0 %v883_v0 }
  0x29   :  { %704 = vmatmul.mubr.msk.bf16.gmra.mrb[8].mxu0 %vm64_vm1, %v48_v15 }
  0x2a   :  { %751 = vmatprep.mubr.msk.bf16.mxu0 %vm884_vm0, %v883_v0  ;;  %718 = vmatpush3.bf16.msra.mxu1 %v813_v16 }
  0x2b   :  { %719 = vmatprep.subr.bf16.mxu1 %v883_v0  ;;  %744 = vmatpush3.bf16.msra.mxu0 %v820_v23 }
  0x2c   :  { %745 = vmatprep.subr.bf16.mxu0 %v883_v0 }
  0x2e   :  { %720 = vmatpush3.bf16.msra.mxu1 %v814_v17 }
  0x2f   :  { %721 = vmatprep.subr.bf16.mxu1 %v883_v0  ;;  %746 = vmatpush3.bf16.msra.mxu0 %v821_v24 }
  0x30   :  { %747 = vmatprep.subr.bf16.mxu0 %v883_v0 }
  0x32   :  { %722 = vmatpush3.bf16.msra.mxu1 %v815_v18 }
  0x33   :  { %763 = vmatprep.subr.bf16.mxu1 %v883_v0  ;;  %748 = vmatpush3.bf16.msra.mxu0 %v822_v53 }
  0x34   :  { %749 = vmatprep.subr.bf16.mxu0 %v883_v0 }
  0x37   :  { %750 = vmatpush3.bf16.msra.mxu0 %v823_v54 }
  0x38   :  { %791 = vmatprep.subr.bf16.mxu0 %v883_v0 }
  0xec   :  { %v108_v26 = vpop.f32.mrb[0].mxu0 }
  0xed   :  { %v109_v27 = vadd.f32 %v617_v25, %v108_v26  ;;  %v697_v28 = vpop.f32.mrb[1].mxu0  ;;  %v830_v26 = vld [vmem:[#allocation3 + $0xb0] sm:$0xff]  }
  0xee   :  { %v111_v29 = vpop.f32.mrb[2].mxu0  ;;  %v633_v28 = vld [vmem:[%s1044_s3 + $0x2] ss:$0 sm:$0xff] }
  0xef   :  { %v112_v30 = vadd.f32 %v617_v25, %v111_v29  ;;  %v698_v31 = vpop.f32.mrb[3].mxu0  ;;  %v131_v32 = vmax.f32 %v109_v27, 0.0  ;;  %v831_v27 = vld [vmem:[#allocation3 + $0xb8] sm:$0xff]  }
  0xf1   :  { %v132_v33 = vmax.f32 %v112_v30, 0.0 }
  0xf3   :  { %v137_v34 = vpack.c.bf16 %v132_v33, %v131_v32 }
  0xf4   :  { %v116_v35 = vpop.f32.mrb[4].mxu0 }
  0xf5   :  { %v117_v36 = vadd.f32 %v617_v25, %v116_v35  ;;  %v701_v37 = vpop.f32.mrb[5].mxu0  ;;  %724 = vmatmul.mubr.bf16.vlgmr.msra.gmra.mrb[0].mxu1 %v137_v34 }
  0xf6   :  { %v119_v38 = vpop.f32.mrb[6].mxu0  ;;  %727 = vmatprep.mubr.msk.bf16.mxu1 %vm884_vm0, %v883_v0  ;;  %764 = vmatpush3.bf16.msra.mxu1 %v824_v55 }
  0xf7   :  { %v120_v39 = vadd.f32 %v617_v25, %v119_v38  ;;  %v702_v40 = vpop.f32.mrb[7].mxu0  ;;  %v133_v41 = vmax.f32 %v117_v36, 0.0  ;;  %765 = vmatprep.subr.bf16.mxu1 %v883_v0 }
  0xf9   :  { %v134_v42 = vmax.f32 %v120_v39, 0.0 }
  0xfa   :  { %766 = vmatpush3.bf16.msra.mxu1 %v825_v56  ;;  %v643_v56 = vld [vmem:[%s1044_s3 + $0x3] ss:$0 sm:$0xff] }
  0xfb   :  { %v138_v43 = vpack.c.bf16 %v134_v42, %v133_v41  ;;  %767 = vmatprep.subr.bf16.mxu1 %v883_v0 }
  0xfc   :  { %v124_v44 = vpop.f32.mrb[8].mxu0 }
  0xfd   :  { %v125_v45 = vadd.f32 %v617_v25, %v124_v44  ;;  %v705_v46 = vpop.f32.mrb[9].mxu0  ;;  %728 = vmatmul.mubr.bf16.gmra.mrb[4].mxu1 %v138_v43 }
  0xfe   :  { %v127_v47 = vpop.f32.mrb[10].mxu0  ;;  %731 = vmatprep.mubr.msk.bf16.mxu1 %vm884_vm0, %v883_v0  ;;  %768 = vmatpush3.bf16.msra.mxu1 %v826_v57 }
  0xff   :  { %v128_v48 = vadd.f32 %v617_v25, %v127_v47  ;;  %v706_v49 = vpop.f32.mrb[11].mxu0  ;;  %v135_v50 = vmax.f32 %v125_v45, 0.0  ;;  %769 = vmatprep.subr.bf16.mxu1 %v883_v0 }
 0x101   :  { %v136_v51 = vmax.f32 %v128_v48, 0.0 }
 0x102   :  { %770 = vmatpush3.bf16.msra.mxu1 %v827_v58 }
 0x103   :  { %v139_v52 = vpack.c.bf16 %v136_v51, %v135_v50  ;;  %771 = vmatprep.subr.bf16.mxu1 %v883_v0 }
 0x105   :  { %732 = vmatmul.mubr.bf16.gmra.mrb[8].mxu1 %v139_v52 }
 0x106   :  { %779 = vmatprep.mubr.msk.bf16.mxu1 %vm884_vm0, %v883_v0  ;;  %772 = vmatpush3.bf16.msra.mxu1 %v828_v59 }
 0x107   :  { %773 = vmatprep.subr.bf16.mxu1 %v883_v0 }
 0x10a   :  { %774 = vmatpush3.bf16.msra.mxu1 %v829_v60 }
 0x10b   :  { %775 = vmatprep.subr.bf16.mxu1 %v883_v0 }
 0x10e   :  { %776 = vmatpush3.bf16.msra.mxu1 %v830_v26 }
 0x10f   :  { %777 = vmatprep.subr.bf16.mxu1 %v883_v0 }
 0x112   :  { %778 = vmatpush3.bf16.msra.mxu1 %v831_v27 }
 0x1c8   :  { %v246_v62 = vpop.f32.mrb[0].mxu1 }
 0x1c9   :  { %v247_v63 = vadd.f32 %v623_v61, %v246_v62  ;;  %v725_v1 = vpop.f32.mrb[1].mxu1 }
 0x1ca   :  { %v249_v2 = vpop.f32.mrb[2].mxu1 }
 0x1cb   :  { %v250_v3 = vadd.f32 %v623_v61, %v249_v2  ;;  %v726_v4 = vpop.f32.mrb[3].mxu1  ;;  %v269_v5 = vmax.f32 %v247_v63, 0.0 }
 0x1cd   :  { %v270_v6 = vmax.f32 %v250_v3, 0.0 }
 0x1cf   :  { %v275_v7 = vpack.c.bf16 %v270_v6, %v269_v5 }
 0x1d0   :  { %v254_v8 = vpop.f32.mrb[4].mxu1 }
 0x1d1   :  { %v255_v9 = vadd.f32 %v623_v61, %v254_v8  ;;  %v729_v10 = vpop.f32.mrb[5].mxu1  ;;  %752 = vmatmul.mubr.bf16.vlgmr.msra.gmra.mrb[12].mxu0 %v275_v7 }
 0x1d2   :  { %v257_v11 = vpop.f32.mrb[6].mxu1  ;;  %755 = vmatprep.mubr.msk.bf16.mxu0 %vm884_vm0, %v883_v0 }
 0x1d3   :  { %v258_v12 = vadd.f32 %v623_v61, %v257_v11  ;;  %v730_v13 = vpop.f32.mrb[7].mxu1  ;;  %v271_v14 = vmax.f32 %v255_v9, 0.0 }
 0x1d5   :  { %v272_v15 = vmax.f32 %v258_v12, 0.0 }
 0x1d7   :  { %v276_v16 = vpack.c.bf16 %v272_v15, %v271_v14 }
 0x1d8   :  { %v262_v17 = vpop.f32.mrb[8].mxu1 }
 0x1d9   :  { %v263_v18 = vadd.f32 %v623_v61, %v262_v17  ;;  %v733_v19 = vpop.f32.mrb[9].mxu1  ;;  %756 = vmatmul.mubr.bf16.gmra.mrb[16].mxu0 %v276_v16 }
 0x1da   :  { %v265_v20 = vpop.f32.mrb[10].mxu1  ;;  %759 = vmatprep.mubr.msk.bf16.mxu0 %vm884_vm0, %v883_v0 }
 0x1db   :  { %v266_v21 = vadd.f32 %v623_v61, %v265_v20  ;;  %v734_v22 = vpop.f32.mrb[11].mxu1  ;;  %v273_v23 = vmax.f32 %v263_v18, 0.0 }
 0x1dc   :  { %v598_v22 = vstv %s1046_s5 }
 0x1dd   :  { %v274_v24 = vmax.f32 %v266_v21, 0.0  ;;  %v556_v21 = vld [vmem:[%s1045_s4] sm:$0xf] }
 0x1df   :  { %v277_v25 = vpack.c.bf16 %v274_v24, %v273_v23 }
 0x1e1   :  { %760 = vmatmul.mubr.bf16.gmra.mrb[20].mxu0 %v277_v25 }
 0x1e2   :  { %797 = vmatprep.mubr.msk.bf16.mxu0 %vm884_vm0, %v883_v0 }
 0x2a4   :  { %v385_v29 = vpop.f32.mrb[12].mxu0 }
 0x2a5   :  { %v386_v30 = vadd.f32 %v633_v28, %v385_v29  ;;  %v753_v31 = vpop.f32.mrb[13].mxu0 }
 0x2a6   :  { %v388_v32 = vpop.f32.mrb[14].mxu0 }
 0x2a7   :  { %v389_v33 = vadd.f32 %v633_v28, %v388_v32  ;;  %v754_v34 = vpop.f32.mrb[15].mxu0  ;;  %v408_v35 = vmax.f32 %v386_v30, 0.0 }
 0x2a9   :  { %v409_v36 = vmax.f32 %v389_v33, 0.0 }
 0x2ab   :  { %v414_v37 = vpack.c.bf16 %v409_v36, %v408_v35 }
 0x2ac   :  { %v393_v38 = vpop.f32.mrb[16].mxu0 }
 0x2ad   :  { %v394_v39 = vadd.f32 %v633_v28, %v393_v38  ;;  %v757_v40 = vpop.f32.mrb[17].mxu0  ;;  %780 = vmatmul.mubr.bf16.vlgmr.msra.gmra.mrb[12].mxu1 %v414_v37 }
 0x2ae   :  { %v396_v41 = vpop.f32.mrb[18].mxu0  ;;  %783 = vmatprep.mubr.msk.bf16.mxu1 %vm884_vm0, %v883_v0 }
 0x2af   :  { %v397_v42 = vadd.f32 %v633_v28, %v396_v41  ;;  %v758_v43 = vpop.f32.mrb[19].mxu0  ;;  %v410_v44 = vmax.f32 %v394_v39, 0.0 }
 0x2b1   :  { %v411_v45 = vmax.f32 %v397_v42, 0.0 }
 0x2b3   :  { %v415_v46 = vpack.c.bf16 %v411_v45, %v410_v44 }
 0x2b4   :  { %v401_v47 = vpop.f32.mrb[20].mxu0 }
 0x2b5   :  { %v402_v48 = vadd.f32 %v633_v28, %v401_v47  ;;  %v761_v49 = vpop.f32.mrb[21].mxu0  ;;  %784 = vmatmul.mubr.bf16.gmra.mrb[16].mxu1 %v415_v46 }
 0x2b6   :  { %v404_v50 = vpop.f32.mrb[22].mxu0  ;;  %787 = vmatprep.mubr.msk.bf16.mxu1 %vm884_vm0, %v883_v0 }
 0x2b7   :  { %v405_v51 = vadd.f32 %v633_v28, %v404_v50  ;;  %v762_v52 = vpop.f32.mrb[23].mxu0  ;;  %v412_v53 = vmax.f32 %v402_v48, 0.0 }
 0x2b9   :  { %v413_v54 = vmax.f32 %v405_v51, 0.0 }
 0x2bb   :  { %v416_v55 = vpack.c.bf16 %v413_v54, %v412_v53 }
 0x2bd   :  { %788 = vmatmul.mubr.bf16.gmra.mrb[20].mxu1 %v416_v55 }
 0x380   :  { %v524_v57 = vpop.f32.mrb[12].mxu1 }
 0x381   :  { %v525_v58 = vadd.f32 %v643_v56, %v524_v57  ;;  %v781_v59 = vpop.f32.mrb[13].mxu1 }
 0x382   :  { %v527_v60 = vpop.f32.mrb[14].mxu1 }
 0x383   :  { %v528_v61 = vadd.f32 %v643_v56, %v527_v60  ;;  %v782_v62 = vpop.f32.mrb[15].mxu1  ;;  %v547_v63 = vmax.f32 %v525_v58, 0.0 }
 0x385   :  { %v548_v1 = vmax.f32 %v528_v61, 0.0 }
 0x387   :  { %v553_v2 = vpack.c.bf16 %v548_v1, %v547_v63 }
 0x388   :  { %v532_v3 = vpop.f32.mrb[16].mxu1 }
 0x389   :  { %v533_v4 = vadd.f32 %v643_v56, %v532_v3  ;;  %v785_v5 = vpop.f32.mrb[17].mxu1  ;;  %792 = vmatpush3.bf16.xpose.msra.mxu0 %v553_v2 }
 0x38a   :  { %v535_v6 = vpop.f32.mrb[18].mxu1  ;;  %793 = vmatprep.subr.bf16.mxu0 %v883_v0 }
 0x38b   :  { %v536_v7 = vadd.f32 %v643_v56, %v535_v6  ;;  %v786_v8 = vpop.f32.mrb[19].mxu1  ;;  %v549_v9 = vmax.f32 %v533_v4, 0.0 }
 0x38d   :  { %v550_v10 = vmax.f32 %v536_v7, 0.0 }
 0x38f   :  { %v554_v11 = vpack.c.bf16 %v550_v10, %v549_v9 }
 0x390   :  { %v540_v12 = vpop.f32.mrb[20].mxu1 }
 0x391   :  { %v541_v13 = vadd.f32 %v643_v56, %v540_v12  ;;  %v789_v14 = vpop.f32.mrb[21].mxu1  ;;  %794 = vmatpush3.bf16.xpose.msra.mxu0 %v554_v11 }
 0x392   :  { %v543_v15 = vpop.f32.mrb[22].mxu1  ;;  %795 = vmatprep.subr.bf16.mxu0 %v883_v0 }
 0x393   :  { %v544_v16 = vadd.f32 %v643_v56, %v543_v15  ;;  %v790_v17 = vpop.f32.mrb[23].mxu1  ;;  %v551_v18 = vmax.f32 %v541_v13, 0.0 }
 0x395   :  { %v552_v19 = vmax.f32 %v544_v16, 0.0 }
 0x397   :  { %v555_v20 = vpack.c.bf16 %v552_v19, %v551_v18 }
 0x399   :  { %796 = vmatpush3.bf16.xpose.msra.mxu0 %v555_v20 }
 0x3a0   :  { %798 = vmatmul.mubr.bf16.vlgmr.msra.gmra.mrb[24].mxu0 %v556_v21 }
 0x473   :  { %v591_v23 = vpop.f32.mrb[24].mxu0 }
 0x474   :  { %v599_v0 = vadd.f32 %v598_v22, %v591_v23  ;;  %v799_v24 = vpop.f32.mrb[25].mxu0 }
 0x475   :  { %v594_v25 = vpop.f32.mrb[26].mxu0 }
 0x476   :  { %v800_v26 = vpop.f32.mrb[27].mxu0  ;;  %601 = vst.msk [vmem:[#allocation6] sm:$0x1] %vm600_vm2, %v599_v0 }
 0x477   :  { %865 = shalt.err (!%p862_p12)
}
 0x478   :  { %s866_s13 = scalar_lea.hbm %s1047_s6, 16 }
 0x479   :  { %p867_p13 = scmp.ne.s32.totalorder %s1047_s6, %s866_s13  ;;  %p870_p0 = scmp.lt.u32.totalorder %s866_s13, %s1047_s6 }
 0x47b   :  { %p872_p1 = pnand %p870_p0, %p867_p13 }
 0x47d   :  { %875 = shalt.err (!%p872_p1)
}
 0x47e   :  { %611 = dma.vmem_to_hbm [thread:$0]  %s609_s10, 16, %s1047_s6, [#allocation5]  }
 0x47f   :  { %878 = dma.done.wait [#allocation5], 16  }
 0x480   :  { %879 = vsyncadd [#allocation5], 4294967280 }
 0x481   :  { %615 = vsyncpa [#allocation4], 1 }
 0x482   :  { %616 = vsyncpa [#allocation5], 1 }

</bundles_post_ra>
